<compile_context>
chip_gen: v7x
topology: tpu7x:2x2x1
jax: 0.10.0
libtpu: 0.0.40
codegen_flags: <defaults>
</compile_context>

<pallas_src>
from collections import namedtuple

import jax
import jax.numpy as jnp
from jax.experimental import pallas as pl
from jax.experimental.pallas import tpu as pltpu

LossTuple = namedtuple("LossTuple", ["patch_count_loss", "total_loss"])

PGN_SIGMA = 1.0  # cfg.SOLVER.PGN_SIGMA


# ----------------------------------------------------------------------------
# Fused PGN count head + _fast_rcnn_count_loss (_smooth_l1_loss) kernel.
# ----------------------------------------------------------------------------
def _fused_pgn_count_loss_kernel(x_ref, w1_ref, b1_ref, w2_ref, b2_ref,
                                 gt_ref, lab_ref, loss_ref):
    """Lane-dense fused head + loss.

      x   : (C,  HW)  feature map, HW on lanes
      w1  : (Cm, C)   first 1x1 conv (transposed storage)
      b1  : (Cm, 1)
      w2  : (A,  Cm)  count head (A anchors per location)
      b2  : (A,  1)
      gt  : (A,  HW)  gt counts  (anchor-major, matches pred layout)
      lab : (A,  HW)  gt labels  (int32, -1 == ignore)
      loss: (1,  1)   scalar loss, SMEM
    """
    # PGN 1x1-conv count head as two MXU matmuls with f32 accumulation.
    # NOTE: K = C / Cm are tiny at these toy shapes so the MXU is mostly idle;
    # this stays the right path once a real backbone (C >= 256) is plugged in,
    # and the kernel is launch-overhead-bound either way.
    h = jnp.dot(w1_ref[...], x_ref[...], preferred_element_type=jnp.float32)
    h = jnp.maximum(h + b1_ref[...], 0.0)
    pred = jnp.dot(w2_ref[...], h, preferred_element_type=jnp.float32) + b2_ref[...]

    # _fast_rcnn_count_loss: in_weight mask, smooth-L1(sigma), normalize.
    sigma2 = PGN_SIGMA ** 2
    w = (lab_ref[...] > -1).astype(jnp.float32)            # in_weight
    diff = w * (pred - gt_ref[...])
    abs_diff = jnp.abs(diff)
    y = jnp.where(abs_diff < 1.0 / sigma2,
                  (sigma2 / 2.0) * diff * diff,
                  abs_diff - 0.5 / sigma2)
    n_valid = jnp.sum(w)                                    # (gt_label > -1).sum()
    # Clamp guards the 0/0 case when every label is -1 (would be NaN/Inf).
    loss_ref[0, 0] = jnp.sum(y) / jnp.maximum(n_valid, 1.0)


def fused_pgn_count_loss(feat, w1, b1, w2, b2, gt_count, gt_label):
    """feat (C, HW) f32, transposed head weights, gt (A, HW) -> scalar loss."""
    C, HW = feat.shape
    Cm = w1.shape[0]
    A = w2.shape[0]
    assert HW % 128 == 0, "H*W must be lane-aligned for the single-block kernel"
    out = pl.pallas_call(
        _fused_pgn_count_loss_kernel,
        out_shape=jax.ShapeDtypeStruct((1, 1), jnp.float32),
        in_specs=[
            pl.BlockSpec((C, HW), lambda: (0, 0)),
            pl.BlockSpec((Cm, C), lambda: (0, 0)),
            pl.BlockSpec((Cm, 1), lambda: (0, 0)),
            pl.BlockSpec((A, Cm), lambda: (0, 0)),
            pl.BlockSpec((A, 1), lambda: (0, 0)),
            pl.BlockSpec((A, HW), lambda: (0, 0)),
            pl.BlockSpec((A, HW), lambda: (0, 0)),
        ],
        # Scalar loss lives in SMEM instead of a padded (8,128) VMEM tile.
        out_specs=pl.BlockSpec(memory_space=pltpu.MemorySpace.SMEM),
    )(feat, w1, b1, w2, b2, gt_count, gt_label)
    return out[0, 0]


# ----------------------------------------------------------------------------
# FasterRCNNTrainer.forward equivalent
# ----------------------------------------------------------------------------
def trainer_forward(imgs, bboxes, labels, scale, pgn_params, gt_count, gt_label):
    if bboxes.shape[0] != 1:
        raise ValueError("Currently only batch size 1 is supported.")
    _, C, H, W = imgs.shape
    # TODO(synk): faster_rcnn.extractor backbone is an injected module with no
    # definition in trainer.py; the image reshaped to a lane-dense (C, H*W)
    # slab stands in as the extracted feature map.
    feat = imgs[0].reshape(C, H * W).astype(jnp.float32)

    # TODO(synk): AnchorIncludeCreator (numpy bbox/anchor IoU target assignment)
    # has no clean Pallas equivalent; deterministic synthetic targets
    # (gt_count, gt_label) are supplied by the caller instead.
    patch_count_loss = fused_pgn_count_loss(feat, *pgn_params, gt_count, gt_label)
    total_loss = patch_count_loss                 # sum([patch_count_loss])
    return LossTuple(patch_count_loss, total_loss)


# pure-JAX reference of the fused forward (for a sanity check)
def _ref_forward(imgs, pgn_params, gt_count, gt_label, sigma):
    w1, b1, w2, b2 = pgn_params
    C = imgs.shape[1]
    feat = imgs[0].reshape(C, -1).astype(jnp.float32)
    h = jnp.maximum(w1 @ feat + b1, 0.0)
    pred = w2 @ h + b2
    sigma2 = sigma ** 2
    w = (gt_label > -1).astype(jnp.float32)
    diff = w * (pred - gt_count)
    ad = jnp.abs(diff)
    y = jnp.where(ad < 1.0 / sigma2, (sigma2 / 2.0) * diff * diff,
                  ad - 0.5 / sigma2)
    return jnp.sum(y) / jnp.maximum(jnp.sum(w), 1.0)


if __name__ == "__main__":
    key = jax.random.PRNGKey(0)
    k_img, k_w1, k_b1, k_w2, k_b2, k_gt, k_lab, k_box = jax.random.split(key, 8)

    B, C, H, W = 1, 4, 16, 16          # batch must be 1 (trainer constraint)
    C_mid, A = 32, 8                   # PGN hidden channels / anchors per loc
    HW = H * W                         # 256 spatial locations (lane axis)

    imgs = jax.random.normal(k_img, (B, C, H, W), dtype=jnp.float32)
    bboxes = jax.random.uniform(k_box, (1, 3, 4), dtype=jnp.float32) * H
    labels = jnp.zeros((1, 3), dtype=jnp.int32)
    scale = 1.0

    # deterministic PGN head parameters, stored transposed so the spatial axis
    # stays on lanes inside the kernel
    w1 = jax.random.normal(k_w1, (C_mid, C), dtype=jnp.float32) * 0.1
    b1 = jax.random.normal(k_b1, (C_mid, 1), dtype=jnp.float32) * 0.1
    w2 = jax.random.normal(k_w2, (A, C_mid), dtype=jnp.float32) * 0.1
    b2 = jax.random.normal(k_b2, (A, 1), dtype=jnp.float32) * 0.1
    pgn_params = (w1, b1, w2, b2)

    # deterministic synthetic anchor targets (stand-in for AnchorIncludeCreator),
    # laid out anchor-major (A, HW) to match the prediction slab
    gt_count = jax.random.normal(k_gt, (A, HW), dtype=jnp.float32)
    gt_label = jax.random.randint(k_lab, (A, HW), -1, 2, dtype=jnp.int32)

    losses = trainer_forward(imgs, bboxes, labels, scale, pgn_params,
                             gt_count, gt_label)
    jax.block_until_ready(losses.total_loss)

    # sanity check against the pure-JAX reference
    ref = _ref_forward(imgs, pgn_params, gt_count, gt_label, PGN_SIGMA)
    assert jnp.isfinite(losses.total_loss)
    assert jnp.allclose(losses.patch_count_loss, ref, rtol=1e-5, atol=1e-5)
    assert jnp.allclose(losses.total_loss, losses.patch_count_loss)

    print("KERNEL_OK")
</pallas_src>

<mosaic_0001>
module attributes {stable_mosaic.version = 11 : i64} {
  func.func @_fused_pgn_count_loss_kernel(%arg0: memref<4x256xf32, #tpu.memory_space<vmem>>, %arg1: memref<32x4xf32, #tpu.memory_space<vmem>>, %arg2: memref<32x1xf32, #tpu.memory_space<vmem>>, %arg3: memref<8x32xf32, #tpu.memory_space<vmem>>, %arg4: memref<8x1xf32, #tpu.memory_space<vmem>>, %arg5: memref<8x256xf32, #tpu.memory_space<vmem>>, %arg6: memref<8x256xi32, #tpu.memory_space<vmem>>, %arg7: memref<1x1xf32, #tpu.memory_space<smem>>) attributes {dimension_semantics = [], scalar_prefetch = 0 : i64, scratch_operands = 0 : i64, tpu.core_type = #tpu.core_type<tc>} {
    %c0 = arith.constant 0 : index
    %c0_0 = arith.constant 0 : index
    %0 = vector.load %arg1[%c0, %c0_0] : memref<32x4xf32, #tpu.memory_space<vmem>>, vector<32x4xf32>
    %c0_1 = arith.constant 0 : index
    %c0_2 = arith.constant 0 : index
    %1 = vector.load %arg0[%c0_1, %c0_2] : memref<4x256xf32, #tpu.memory_space<vmem>>, vector<4x256xf32>
    %cst = arith.constant dense<0.000000e+00> : vector<32x256xf32>
    %2 = tpu.matmul %0, %1, %cst {dimension_numbers = #tpu.dot_dimension_numbers<[1], [0], [0], [1], [0, 0, 1, 1], [], []>} : vector<32x4xf32>, vector<4x256xf32>, vector<32x256xf32> -> vector<32x256xf32>
    %c0_3 = arith.constant 0 : index
    %c0_4 = arith.constant 0 : index
    %3 = vector.load %arg2[%c0_3, %c0_4] : memref<32x1xf32, #tpu.memory_space<vmem>>, vector<32x1xf32>
    %4 = vector.broadcast %3 : vector<32x1xf32> to vector<32x256xf32>
    %5 = arith.addf %2, %4 : vector<32x256xf32>
    %cst_5 = arith.constant 0.000000e+00 : f32
    %6 = vector.broadcast %cst_5 : f32 to vector<32x256xf32>
    %7 = arith.maximumf %5, %6 : vector<32x256xf32>
    %c0_6 = arith.constant 0 : index
    %c0_7 = arith.constant 0 : index
    %8 = vector.load %arg3[%c0_6, %c0_7] : memref<8x32xf32, #tpu.memory_space<vmem>>, vector<8x32xf32>
    %cst_8 = arith.constant dense<0.000000e+00> : vector<8x256xf32>
    %9 = tpu.matmul %8, %7, %cst_8 {dimension_numbers = #tpu.dot_dimension_numbers<[1], [0], [0], [1], [0, 0, 1, 1], [], []>} : vector<8x32xf32>, vector<32x256xf32>, vector<8x256xf32> -> vector<8x256xf32>
    %c0_9 = arith.constant 0 : index
    %c0_10 = arith.constant 0 : index
    %10 = vector.load %arg4[%c0_9, %c0_10] : memref<8x1xf32, #tpu.memory_space<vmem>>, vector<8x1xf32>
    %11 = vector.broadcast %10 : vector<8x1xf32> to vector<8x256xf32>
    %12 = arith.addf %9, %11 : vector<8x256xf32>
    %c0_11 = arith.constant 0 : index
    %c0_12 = arith.constant 0 : index
    %13 = vector.load %arg6[%c0_11, %c0_12] : memref<8x256xi32, #tpu.memory_space<vmem>>, vector<8x256xi32>
    %c-1_i32 = arith.constant -1 : i32
    %14 = vector.broadcast %c-1_i32 : i32 to vector<8x256xi32>
    %15 = arith.cmpi sgt, %13, %14 : vector<8x256xi32>
    %16 = arith.extui %15 : vector<8x256xi1> to vector<8x256xi32>
    %17 = arith.sitofp %16 : vector<8x256xi32> to vector<8x256xf32>
    %c0_13 = arith.constant 0 : index
    %c0_14 = arith.constant 0 : index
    %18 = vector.load %arg5[%c0_13, %c0_14] : memref<8x256xf32, #tpu.memory_space<vmem>>, vector<8x256xf32>
    %19 = arith.subf %12, %18 : vector<8x256xf32>
    %20 = arith.mulf %17, %19 : vector<8x256xf32>
    %21 = math.absf %20 : vector<8x256xf32>
    %cst_15 = arith.constant 1.000000e+00 : f32
    %22 = vector.broadcast %cst_15 : f32 to vector<8x256xf32>
    %23 = arith.cmpf olt, %21, %22 : vector<8x256xf32>
    %cst_16 = arith.constant 5.000000e-01 : f32
    %24 = vector.broadcast %cst_16 : f32 to vector<8x256xf32>
    %25 = arith.mulf %24, %20 : vector<8x256xf32>
    %26 = arith.mulf %25, %20 : vector<8x256xf32>
    %cst_17 = arith.constant 5.000000e-01 : f32
    %27 = vector.broadcast %cst_17 : f32 to vector<8x256xf32>
    %28 = arith.subf %21, %27 : vector<8x256xf32>
    %29 = arith.select %23, %26, %28 : vector<8x256xi1>, vector<8x256xf32>
    %30 = vector.shape_cast %17 : vector<8x256xf32> to vector<1x8x256xf32>
    %cst_18 = arith.constant dense<0.000000e+00> : vector<1xf32>
    %31 = vector.multi_reduction <add>, %30, %cst_18 [1, 2] : vector<1x8x256xf32> to vector<1xf32>
    %32 = vector.shape_cast %31 : vector<1xf32> to vector<1x1x1xf32>
    %33 = vector.extract %32[0, 0, 0] : f32 from vector<1x1x1xf32>
    %34 = vector.shape_cast %29 : vector<8x256xf32> to vector<1x8x256xf32>
    %cst_19 = arith.constant dense<0.000000e+00> : vector<1xf32>
    %35 = vector.multi_reduction <add>, %34, %cst_19 [1, 2] : vector<1x8x256xf32> to vector<1xf32>
    %36 = vector.shape_cast %35 : vector<1xf32> to vector<1x1x1xf32>
    %37 = vector.extract %36[0, 0, 0] : f32 from vector<1x1x1xf32>
    %cst_20 = arith.constant 1.000000e+00 : f32
    %38 = arith.maximumf %33, %cst_20 : f32
    %39 = arith.divf %37, %38 : f32
    %c0_21 = arith.constant 0 : index
    %c0_22 = arith.constant 0 : index
    %40 = memref.load %arg7[%c0_21, %c0_22] : memref<1x1xf32, #tpu.memory_space<smem>>
    memref.store %39, %arg7[%c0_21, %c0_22] : memref<1x1xf32, #tpu.memory_space<smem>>
    return
  }
}

</mosaic_0001>

<bundles_post_ra>
// kernel: tpu_custom_call.1
= control target key start
LH: loop header
LB: loop body
LE: loop exit
PB: predicated region body
PF: predicated region fallthrough
CT: control target
= control target key end

     0   :  { %vm71_vm0 = vcmask 1043456   ;;  %v367_v2 = vmov 0.0   ;;  %vm58_vm1 = vcmask 31744   ;;  %v368_v5 = vmov 0   ;;  %s472_s0 = inlined_call_operand.vmem [shape: f32[4,256], index: 0, kind: input, shape index: {}]   ;;  %s473_s1 = inlined_call_operand.vmem [shape: f32[32,4], index: 1, kind: input, shape index: {}]   ;;  %s474_s2 = inlined_call_operand.vmem [shape: f32[32,1], index: 2, kind: input, shape index: {}]   ;;  %s475_s3 = inlined_call_operand.vmem [shape: f32[8,32], index: 3, kind: input, shape index: {}]   ;;  %s476_s4 = inlined_call_operand.vmem [shape: f32[8,1], index: 4, kind: input, shape index: {}]   ;;  %s477_s5 = inlined_call_operand.vmem [shape: f32[8,256], index: 5, kind: input, shape index: {}]   ;;  %s478_s6 = inlined_call_operand.vmem [shape: s32[8,256], index: 6, kind: input, shape index: {}]   ;;  %s479_s7 = inlined_call_operand.hbm [shape: f32[1,1], index: 7, kind: output, shape index: {}]  }
   0x1   :  { %v31_v0 = vld [vmem:[%s472_s0] sm:$0xff]  ;;  %140 = vmatprep.mubr.f32.mxu0 %v367_v2  ;;  %248 = vmatprep.mubr.f32.mxu1 %v367_v2  ;;  %v34_v6 = vld [vmem:[%s474_s2 + $0x10] sm:$0xff] }
   0x2   :  { %v57_v1 = vcombine.high %v31_v0, %v31_v0  ;;  %v32_v3 = vld [vmem:[%s474_s2] sm:$0xff]  ;;  %350 = vset.pattern.permute.xlu0 %v368_v5  ;;  %351 = vset.pattern.permute.xlu1 %v368_v5 }
   0x3   :  { %v27_v4 = vld [vmem:[%s473_s1] sm:$0xff]  ;;  %38 = vperm.xlu0 %350, %v32_v3  }
   0x4   :  { %321 = vmatprep.subr.msk.mxu0 %vm71_vm0, %v57_v1 }
   0x5   :  { %12 = vsyncpa [#allocation3], 0  ;;  %322 = vmatpush1.msk.msra.mxu0 %vm71_vm0, %v31_v0  ;;  %v33_v7 = vld [vmem:[%s474_s2 + $0x8] sm:$0xff]  ;;  %48 = vperm.xlu1 %351, %v34_v6   ;;  %v35_v8 = vld [vmem:[%s474_s2 + $0x18] sm:$0xff]  ;;  %vm180_vm4 = vcmask 261120   ;;  %s369_s25 = smov 1.0  }
   0x6   :  { %323 = vmatmul.mubr.msk.f32.vlgmr.msra.gmra.mrb[0].mxu0 %vm58_vm1, %v27_v4  ;;  %v28_v9 = vld [vmem:[%s473_s1 + $0x8] sm:$0xff]  ;;  %v174_v10 = vld [vmem:[%s476_s4] sm:$0xff]  ;;  %v29_v11 = vld [vmem:[%s473_s1 + $0x10] sm:$0xff]  ;;  %s355_s0 = scalar_lea.hbm %s479_s7, 16 }
   0x7   :  { %146 = vmatprep.mubr.f32.mxu0 %v367_v2  ;;  %43 = vperm.xlu0 %350, %v33_v7   ;;  %v30_v12 = vld [vmem:[%s473_s1 + $0x18] sm:$0xff]  ;;  %v255_v13 = vld [vmem:[%s478_s6] sm:$0xff]  ;;  %v256_v14 = vld [vmem:[%s478_s6 + $0x8] sm:$0xff]  ;;  %p356_p0 = scmp.ne.s32.totalorder %s479_s7, %s355_s0  ;;  %p359_p1 = scmp.lt.u32.totalorder %s355_s0, %s479_s7 }
   0x8   :  { %vm257_vm2 = vcmp.gt.s32.totalorder %v255_v13, 4294967295  ;;  %vm258_vm3 = vcmp.gt.s32.totalorder %v256_v14, 4294967295  ;;  %v173_v50 = vld [vmem:[%s475_s3] sm:$0xff]  ;;  %v264_v63 = vld [vmem:[%s477_s5 + $0x8] sm:$0xff] }
   0x9   :  { %53 = vperm.xlu1 %351, %v35_v8   ;;  %v328_v15 = vsel %vm257_vm2, 1.0, %v367_v2  ;;  %v329_v16 = vsel %vm258_vm3, 1.0, %v367_v2  ;;  %v263_v60 = vld [vmem:[%s477_s5] sm:$0xff]  ;;  %p361_p2 = pnand %p359_p1, %p356_p0 }
   0xa   :  { %324 = vmatmul.mubr.msk.f32.gmra.mrb[2].mxu0 %vm58_vm1, %v28_v9  ;;  %v281_v17 = vadd.f32 %v329_v16, %v328_v15 }
   0xb   :  { %152 = vmatprep.mubr.f32.mxu0 %v367_v2  ;;  %177 = vperm.xlu0 %350, %v174_v10  }
   0xe   :  { %325 = vmatmul.mubr.msk.f32.gmra.mrb[4].mxu0 %vm58_vm1, %v29_v11 }
   0xf   :  { %158 = vmatprep.mubr.f32.mxu0 %v367_v2 }
  0x12   :  { %326 = vmatmul.mubr.msk.f32.gmra.mrb[6].mxu0 %vm58_vm1, %v30_v12 }
  0x2d   :  { %282 = vadd.xlane.f32.xlu1 %v281_v17 }
  0x82   :  { %v39_v18 = vpop.permute.xlu0 %38 }
  0x84   :  { %v49_v27 = vpop.permute.xlu1 %48 }
  0x86   :  { %v44_v22 = vpop.permute.xlu0 %43 }
  0x88   :  { %v54_v38 = vpop.permute.xlu1 %53 }
  0x8a   :  { %v178_v58 = vpop.permute.xlu0 %177 }
  0xba   :  { %v283_v51 = vpop.xlane.xlu1 %282 }
  0xbb   :  { %v284_v52 = vrot.slane %v283_v51, 4 }
  0xbd   :  { %v285_v53 = vadd.f32 %v284_v52, %v283_v51 }
  0xbf   :  { %v286_v54 = vrot.slane %v285_v53, 2 }
  0xc1   :  { %v287_v55 = vadd.f32 %v286_v54, %v285_v53 }
  0xc3   :  { %v288_v56 = vrot.slane %v287_v55, 1 }
  0xc5   :  { %v289_v57 = vadd.f32 %v288_v56, %v287_v55 }
  0xc7   :  { %340 = vpush %v289_v57 }
  0xd9   :  { %v142_v19 = vpop.f32.mrb[0].mxu0 }
  0xda   :  { %v144_v20 = vpop.f32.mrb[1].mxu0  ;;  %v143_v21 = vadd.f32 %v142_v19, %v39_v18 }
  0xdb   :  { %v145_v23 = vadd.f32 %v144_v20, %v39_v18 }
  0xdc   :  { %v165_v29 = vmax.f32 %v143_v21, 0.0 }
  0xdd   :  { %v148_v24 = vpop.f32.mrb[2].mxu0  ;;  %v166_v31 = vmax.f32 %v145_v23, 0.0 }
  0xde   :  { %v149_v25 = vadd.f32 %v148_v24, %v44_v22  ;;  %v150_v26 = vpop.f32.mrb[3].mxu0 }
  0xdf   :  { %v151_v28 = vadd.f32 %v150_v26, %v44_v22 }
  0xe0   :  { %v167_v30 = vmax.f32 %v149_v25, 0.0 }
  0xe1   :  { %v168_v32 = vmax.f32 %v151_v28, 0.0  ;;  %v154_v33 = vpop.f32.mrb[4].mxu0 }
  0xe2   :  { %v156_v34 = vpop.f32.mrb[5].mxu0  ;;  %v334_v35 = vpack.c.bf16 %v167_v30, %v165_v29  ;;  %v155_v37 = vadd.f32 %v154_v33, %v49_v27 }
  0xe3   :  { %v332_v36 = vpack.c.bf16 %v168_v32, %v166_v31  ;;  %v157_v39 = vadd.f32 %v156_v34, %v49_v27 }
  0xe4   :  { %v169_v44 = vmax.f32 %v155_v37, 0.0 }
  0xe5   :  { %v160_v40 = vpop.f32.mrb[6].mxu0  ;;  %333 = vmatprep.subr.bf16.mxu1 %v332_v36  ;;  %v170_v46 = vmax.f32 %v157_v39, 0.0 }
  0xe6   :  { %v161_v41 = vadd.f32 %v160_v40, %v54_v38  ;;  %v162_v42 = vpop.f32.mrb[7].mxu0  ;;  %335 = vmatpush1.bf16.msra.mxu1 %v334_v35 }
  0xe7   :  { %v163_v43 = vadd.f32 %v162_v42, %v54_v38 }
  0xe8   :  { %v171_v45 = vmax.f32 %v161_v41, 0.0 }
  0xe9   :  { %v172_v47 = vmax.f32 %v163_v43, 0.0 }
  0xea   :  { %v338_v48 = vpack.c.bf16 %v171_v45, %v169_v44 }
  0xeb   :  { %v336_v49 = vpack.c.bf16 %v172_v47, %v170_v46 }
  0xed   :  { %337 = vmatprep.subr.bf16.mxu1 %v336_v49 }
  0xee   :  { %339 = vmatpush1.bf16.msra.mxu1 %v338_v48 }
  0xf1   :  { %327 = vmatmul.mubr.msk.f32.vlgmr.msra.gmra.mrb[0].mxu1 %vm180_vm4, %v173_v50 }
  0xf8   :  { %s341_s5 = spop %340 }
  0xf9   :  { %s301_s26 = smax.f32 %s369_s25, %s341_s5 }
  0xfa   :  { %v302_v18 = vstv %s301_s26 }
  0xfb   :  { %353 = vrcp.f32 %v302_v18 }
 0x105   :  { %v354_v24 = vpop.eup %353 }
 0x1c4   :  { %v250_v59 = vpop.f32.mrb[0].mxu1 }
 0x1c5   :  { %v251_v61 = vadd.f32 %v250_v59, %v178_v58  ;;  %v252_v62 = vpop.f32.mrb[1].mxu1 }
 0x1c6   :  { %v253_v0 = vadd.f32 %v252_v62, %v178_v58 }
 0x1c7   :  { %v265_v1 = vsub.f32 %v251_v61, %v263_v60 }
 0x1c8   :  { %v266_v2 = vsub.f32 %v253_v0, %v264_v63 }
 0x1c9   :  { %v267_v3 = vmul.f32 %v328_v15, %v265_v1 }
 0x1ca   :  { %v268_v4 = vmul.f32 %v329_v16, %v266_v2 }
 0x1cb   :  { %v269_v5 = vand.u32 2147483647, %v267_v3  ;;  %v273_v6 = vmul.f32 0.5, %v267_v3 }
 0x1cc   :  { %v270_v7 = vand.u32 2147483647, %v268_v4  ;;  %v274_v8 = vmul.f32 0.5, %v268_v4 }
 0x1cd   :  { %vm271_vm5 = vcmp.lt.f32.partialorder %v269_v5, 1.0  ;;  %v275_v9 = vmul.f32 %v273_v6, %v267_v3  ;;  %v330_v10 = vadd.f32 -0.5, %v269_v5 }
 0x1ce   :  { %vm272_vm6 = vcmp.lt.f32.partialorder %v270_v7, 1.0  ;;  %v276_v11 = vmul.f32 %v274_v8, %v268_v4  ;;  %v331_v12 = vadd.f32 -0.5, %v270_v7 }
 0x1cf   :  { %v279_v13 = vsel %vm271_vm5, %v275_v9, %v330_v10 }
 0x1d0   :  { %v280_v14 = vsel %vm272_vm6, %v276_v11, %v331_v12 }
 0x1d1   :  { %v291_v17 = vadd.f32 %v280_v14, %v279_v13 }
 0x1d3   :  { %292 = vadd.xlane.f32.xlu0 %v291_v17 }
 0x260   :  { %v293_v15 = vpop.xlane.xlu0 %292 }
 0x261   :  { %v294_v16 = vrot.slane %v293_v15, 4 }
 0x263   :  { %v295_v19 = vadd.f32 %v294_v16, %v293_v15 }
 0x265   :  { %v296_v20 = vrot.slane %v295_v19, 2 }
 0x267   :  { %v297_v21 = vadd.f32 %v296_v20, %v295_v19 }
 0x269   :  { %v298_v22 = vrot.slane %v297_v21, 1 }
 0x26b   :  { %v299_v23 = vadd.f32 %v298_v22, %v297_v21 }
 0x26d   :  { %342 = vpush %v299_v23 }
 0x26e   :  { %344 = vpush %v354_v24 }
 0x29e   :  { %s343_s27 = spop %342 }
 0x29f   :  { %s345_s28 = spop %344 }
 0x2a0   :  { %s305_s29 = smul.f32 %s345_s28, %s343_s27 }
 0x2a2   :  { %307 = sst [smem:[#allocation2]] %s305_s29 }
 0x2a3   :  { %364 = shalt.err (!%p361_p2)
}
 0x2a4   :  { %s370_s13 = smov [#allocation2]  }
 0x2a5   :  { %315 = dma.smem_to_hbm %s370_s13, 16, %s479_s7, [#allocation3]  }
 0x2a6   :  { %365 = dma.done.wait [#allocation3], 16  }
 0x2a7   :  { %366 = vsyncadd [#allocation3], 4294967280 }
 0x2a8   :  { %319 = sfence }
 0x2a9   :  { %320 = vsyncpa [#allocation3], 1 }

</bundles_post_ra>
